<compile_context>
chip_gen: v7x
topology: tpu7x:2x2x1
jax: 0.10.0
libtpu: 0.0.40
codegen_flags: <defaults>
</compile_context>

<pallas_src>
import functools
import math

import jax
import jax.numpy as jnp
from jax.experimental import pallas as pl
from jax.experimental.pallas import tpu as pltpu


# ----------------------------------------------------------------------------
# Tiling / VMEM helpers
# ----------------------------------------------------------------------------
def _pick_sublane_tile(n, max_tile=256):
    """Divisor of n <= max_tile, preferring 256/128/8 alignment (MXU edge)."""
    if n <= max_tile:
        return n
    for align in (256, 128, 8):
        t = (max_tile // align) * align
        while t >= align:
            if n % t == 0:
                return t
            t -= align
    return n


def _pick_lane_tile(n, max_tile=512):
    """Lane (last-dim) block: must be a multiple of 128 or the full dim."""
    if n <= max_tile or n % 128 != 0:
        return n
    t = (max_tile // 128) * 128
    while t >= 128:
        if n % t == 0:
            return t
        t -= 128
    return n


def _physical_vmem_bytes():
    try:
        info = pltpu.get_tpu_info()
        for attr in ("vmem_capacity_bytes", "vmem_size_bytes", "vmem_bytes"):
            v = getattr(info, attr, None)
            if v:
                return int(v)
    except Exception:
        pass
    return 64 * 1024 * 1024  # conservative default (v7x physical VMEM)


def _vmem_limit(per_step_bytes):
    """Limit derived from actual block/scratch sizes, clamped below physical."""
    ceiling = (_physical_vmem_bytes() * 3) // 4   # keep double-buffer headroom
    need = int(per_step_bytes) + (4 << 20)        # + Mosaic internal scratch slack
    return max(16 << 20, min(need, ceiling))


# ----------------------------------------------------------------------------
# Kernel 1: tiled linear projection  y = x @ W_t + b   (W_t pre-transposed)
# ----------------------------------------------------------------------------
def _linear_kernel(x_ref, w_ref, b_ref, o_ref, acc_ref):
    k = pl.program_id(2)

    @pl.when(k == 0)
    def _init():
        acc_ref[...] = jnp.zeros_like(acc_ref)

    acc_ref[...] += jnp.dot(x_ref[...], w_ref[...],
                            preferred_element_type=jnp.float32)

    @pl.when(k == pl.num_programs(2) - 1)
    def _finalize():
        o_ref[...] = (acc_ref[...] + b_ref[...]).astype(o_ref.dtype)


def pallas_linear(x2d, w_t, b, out_dtype, *, tm_max=256, tn_max=512, tk_max=512):
    """x2d: (N, D_in), w_t: (D_in, D_out), b: (D_out,) f32 -> (N, D_out)."""
    n, d_in = x2d.shape
    d_out = w_t.shape[1]
    tm = _pick_sublane_tile(n, tm_max)
    tn = _pick_lane_tile(d_out, tn_max)
    tk = _pick_lane_tile(d_in, tk_max)

    isz = jnp.dtype(x2d.dtype).itemsize
    wsz = jnp.dtype(w_t.dtype).itemsize
    osz = jnp.dtype(out_dtype).itemsize
    per_step = (2 * (tm * tk * isz + tk * tn * wsz + tn * 4 + tm * tn * osz)
                + tm * tn * 4)
    cost = pl.CostEstimate(
        flops=2 * n * d_in * d_out,
        transcendentals=0,
        bytes_accessed=(n * d_in * isz + d_in * d_out * wsz + d_out * 4
                        + n * d_out * osz))

    return pl.pallas_call(
        _linear_kernel,
        out_shape=jax.ShapeDtypeStruct((n, d_out), out_dtype),
        grid_spec=pltpu.PrefetchScalarGridSpec(
            num_scalar_prefetch=0,
            grid=(n // tm, d_out // tn, d_in // tk),
            in_specs=[
                pl.BlockSpec((tm, tk), lambda i, j, k: (i, k)),
                pl.BlockSpec((tk, tn), lambda i, j, k: (k, j)),
                pl.BlockSpec((1, tn), lambda i, j, k: (0, j)),
            ],
            out_specs=pl.BlockSpec((tm, tn), lambda i, j, k: (i, j)),
            scratch_shapes=[pltpu.VMEM((tm, tn), jnp.float32)],
        ),
        compiler_params=pltpu.CompilerParams(
            dimension_semantics=("parallel", "parallel", "arbitrary"),
            vmem_limit_bytes=_vmem_limit(per_step)),
        cost_estimate=cost,
    )(x2d, w_t, b.reshape(1, d_out).astype(jnp.float32))


# ----------------------------------------------------------------------------
# Kernel 2: flash attention on (B*H, S, Dh) head-major layout
# ----------------------------------------------------------------------------
def _flash_attn_kernel(q_ref, k_ref, v_ref, o_ref, m_ref, l_ref, acc_ref):
    kv = pl.program_id(2)

    @pl.when(kv == 0)
    def _init():
        m_ref[...] = jnp.full_like(m_ref, -jnp.inf)
        l_ref[...] = jnp.zeros_like(l_ref)
        acc_ref[...] = jnp.zeros_like(acc_ref)

    # 1/sqrt(dim_per_head) is pre-folded into the query projection weights.
    q = q_ref[...]                      # (tq, dh)
    k = k_ref[...]                      # (tkv, dh)
    v = v_ref[...]                      # (tkv, dh)
    # QK^T without a materialized transpose: contract the last dims.
    s = jax.lax.dot_general(q, k, (((1,), (1,)), ((), ())),
                            preferred_element_type=jnp.float32)  # (tq, tkv) f32
    m_prev = m_ref[...]
    m_new = jnp.maximum(m_prev, jnp.max(s, axis=-1, keepdims=True))
    alpha = jnp.exp(m_prev - m_new)
    p = jnp.exp(s - m_new)
    l_ref[...] = alpha * l_ref[...] + jnp.sum(p, axis=-1, keepdims=True)
    acc_ref[...] = alpha * acc_ref[...] + jnp.dot(
        p.astype(v.dtype), v, preferred_element_type=jnp.float32)
    m_ref[...] = m_new

    @pl.when(kv == pl.num_programs(2) - 1)
    def _finalize():
        # Exact reciprocal (once per q tile) for parity with PyTorch softmax.
        o_ref[...] = (acc_ref[...] / l_ref[...]).astype(o_ref.dtype)


def pallas_flash_attention(q, k, v, out_dtype=jnp.float32, *,
                           tq_max=256, tkv_max=256):
    """q,k,v: (B*H, S, Dh); 1/sqrt(Dh) already folded into q. -> (B*H, S, Dh)."""
    gh, s, dh = q.shape
    tq = _pick_sublane_tile(s, tq_max)
    tkv = _pick_sublane_tile(s, tkv_max)

    isz = jnp.dtype(q.dtype).itemsize
    osz = jnp.dtype(out_dtype).itemsize
    per_step = (2 * (tq * dh * isz + 2 * tkv * dh * isz + tq * dh * osz)
                + 2 * tq * 128 * 4 + tq * dh * 4)
    cost = pl.CostEstimate(
        flops=4 * gh * s * s * dh,
        transcendentals=gh * s * s,
        bytes_accessed=3 * gh * s * dh * isz + gh * s * dh * osz)

    # TODO(synk): for dh <= 64 on v6e/v7x, block 2 heads per grid step
    #             (128-wide lane blocks) to relieve the single EUP exp pipe.
    return pl.pallas_call(
        _flash_attn_kernel,
        out_shape=jax.ShapeDtypeStruct((gh, s, dh), out_dtype),
        grid_spec=pltpu.PrefetchScalarGridSpec(
            num_scalar_prefetch=0,
            grid=(gh, s // tq, s // tkv),
            in_specs=[
                pl.BlockSpec((None, tq, dh), lambda g, qi, ki: (g, qi, 0)),
                pl.BlockSpec((None, tkv, dh), lambda g, qi, ki: (g, ki, 0)),
                pl.BlockSpec((None, tkv, dh), lambda g, qi, ki: (g, ki, 0)),
            ],
            out_specs=pl.BlockSpec((None, tq, dh), lambda g, qi, ki: (g, qi, 0)),
            scratch_shapes=[
                pltpu.VMEM((tq, 1), jnp.float32),    # running max
                pltpu.VMEM((tq, 1), jnp.float32),    # running denominator
                pltpu.VMEM((tq, dh), jnp.float32),   # f32 output accumulator
            ]),
        compiler_params=pltpu.CompilerParams(
            dimension_semantics=("parallel", "parallel", "arbitrary"),
            vmem_limit_bytes=_vmem_limit(per_step)),
        cost_estimate=cost,
    )(q, k, v)


# ----------------------------------------------------------------------------
# Module wrapper (mirrors Multi_Head_Attention.forward, mask=None, eval mode)
# ----------------------------------------------------------------------------
class MultiHeadAttentionPallas:
    def __init__(self, dim_proj, head_count, dropout_rate, key,
                 use_bf16_matmul=False, attn_out_dtype=jnp.float32):
        assert dim_proj % head_count == 0
        self.dim_proj = dim_proj
        self.head_count = head_count
        self.dim_per_head = dim_proj // head_count
        self.dropout_rate = dropout_rate          # identity at inference
        self.use_bf16_matmul = use_bf16_matmul    # bf16 MXU operands, f32 accum
        self.attn_out_dtype = attn_out_dtype
        self._cdt = jnp.bfloat16 if use_bf16_matmul else jnp.float32

        ks = jax.random.split(key, 6)
        bound = 1.0 / math.sqrt(dim_proj)

        def u(kk, shape):
            return jax.random.uniform(kk, shape, jnp.float32, -bound, bound)

        # Unscaled weights (pre-transposed to (D_in, D_out)) kept for reference.
        self.wk_t = u(ks[0], (dim_proj, dim_proj)).T
        self.bk = u(ks[1], (dim_proj,))
        self.wv_t = u(ks[2], (dim_proj, dim_proj)).T
        self.bv = u(ks[3], (dim_proj,))
        self.wq_t = u(ks[4], (dim_proj, dim_proj)).T
        self.bq = u(ks[5], (dim_proj,))

        # Fold 1/sqrt(dim_per_head) into the query projection (exact, free).
        scale = 1.0 / math.sqrt(float(self.dim_per_head))
        wq_t_scaled = self.wq_t * scale
        self._bq_scaled = self.bq * scale

        # Cache compute-dtype casts + fused-QKV packing once (not per forward).
        cdt = self._cdt
        self._wk_c = self.wk_t.astype(cdt)
        self._wv_c = self.wv_t.astype(cdt)
        self._wq_c = wq_t_scaled.astype(cdt)
        self._w_packed_c = jnp.concatenate(
            [self._wk_c, self._wv_c, self._wq_c], axis=1)
        self._b_packed = jnp.concatenate([self.bk, self.bv, self._bq_scaled])

    def _split_heads(self, x2d, b, s):
        h, dh = self.head_count, self.dim_per_head
        # TODO(synk): when dim_per_head is a multiple of 128, fuse this split
        #             into the projection kernel's output index_map instead of
        #             an XLA transpose.
        return (x2d.reshape(b, s, h, dh).transpose(0, 2, 1, 3)
                .reshape(b * h, s, dh))

    def __call__(self, key_in, value_in, query_in):
        b, s, d = key_in.shape
        n = b * s
        cdt = self._cdt
        h, dh = self.head_count, self.dim_per_head

        if key_in is value_in and key_in is query_in:
            # Self-attention fast path: fused QKV GEMM (activation read once,
            # single launch). Note: identity check is perf-only.
            y = pallas_linear(key_in.reshape(n, d).astype(cdt),
                              self._w_packed_c, self._b_packed, cdt)
            k2d, v2d, q2d = y[:, :d], y[:, d:2 * d], y[:, 2 * d:]
        else:
            k2d = pallas_linear(key_in.reshape(n, d).astype(cdt),
                                self._wk_c, self.bk, cdt)
            v2d = pallas_linear(value_in.reshape(n, d).astype(cdt),
                                self._wv_c, self.bv, cdt)
            q2d = pallas_linear(query_in.reshape(n, d).astype(cdt),
                                self._wq_c, self._bq_scaled, cdt)

        # (B*H, S, Dh) head-major layout: heads become a parallel grid axis.
        q3 = self._split_heads(q2d, b, s)
        k3 = self._split_heads(k2d, b, s)
        v3 = self._split_heads(v2d, b, s)

        ctx = pallas_flash_attention(q3, k3, v3, out_dtype=self.attn_out_dtype)
        return (ctx.reshape(b, h, s, dh).transpose(0, 2, 1, 3)
                .reshape(b, s, h * dh))


# ----------------------------------------------------------------------------
# Pure-JAX reference for correctness check
# ----------------------------------------------------------------------------
def reference_forward(mod, key_in, value_in, query_in):
    b, s, d = key_in.shape
    h, dh = mod.head_count, mod.dim_per_head

    def proj(x, w_t, bias):
        y = x.reshape(b * s, d) @ w_t + bias
        return y.reshape(b, s, h, dh).transpose(0, 2, 1, 3)

    k_ = proj(key_in, mod.wk_t, mod.bk)
    v_ = proj(value_in, mod.wv_t, mod.bv)
    q_ = proj(query_in, mod.wq_t, mod.bq)
    scores = jnp.einsum("bhqd,bhkd->bhqk", q_, k_) / math.sqrt(float(dh))
    probs = jax.nn.softmax(scores, axis=-1)
    ctx = jnp.einsum("bhqk,bhkd->bhqd", probs, v_)
    return ctx.transpose(0, 2, 1, 3).reshape(b, s, h * dh)


if __name__ == "__main__":
    B, S, DIM_PROJ, HEADS = 2, 8, 32, 4

    root = jax.random.PRNGKey(0)
    k_param, k_key, k_val, k_qry = jax.random.split(root, 4)

    key_in = jax.random.normal(k_key, (B, S, DIM_PROJ), jnp.float32)
    value_in = jax.random.normal(k_val, (B, S, DIM_PROJ), jnp.float32)
    query_in = jax.random.normal(k_qry, (B, S, DIM_PROJ), jnp.float32)

    # --- f32 path, cross-attention (three distinct inputs) ---
    mod = MultiHeadAttentionPallas(DIM_PROJ, HEADS, dropout_rate=0.1, key=k_param)
    out = jax.block_until_ready(mod(key_in, value_in, query_in))
    ref = reference_forward(mod, key_in, value_in, query_in)
    assert out.shape == (B, S, DIM_PROJ), out.shape
    assert jnp.allclose(out, ref, atol=2e-3, rtol=2e-3), \
        float(jnp.max(jnp.abs(out - ref)))

    # --- f32 path, self-attention (exercises the fused-QKV GEMM) ---
    out_sa = jax.block_until_ready(mod(query_in, query_in, query_in))
    ref_sa = reference_forward(mod, query_in, query_in, query_in)
    assert jnp.allclose(out_sa, ref_sa, atol=2e-3, rtol=2e-3), \
        float(jnp.max(jnp.abs(out_sa - ref_sa)))

    # --- bf16 MXU operands + f32 accumulation path (looser tolerance) ---
    mod_bf16 = MultiHeadAttentionPallas(DIM_PROJ, HEADS, dropout_rate=0.1,
                                        key=k_param, use_bf16_matmul=True)
    out_bf = jax.block_until_ready(mod_bf16(key_in, value_in, query_in))
    assert jnp.allclose(out_bf, ref, atol=5e-2, rtol=5e-2), \
        float(jnp.max(jnp.abs(out_bf - ref)))

    print("KERNEL_OK")
</pallas_src>

<mosaic_0001>
module attributes {stable_mosaic.version = 11 : i64} {
  func.func @_linear_kernel(%arg0: i32, %arg1: i32, %arg2: i32, %arg3: memref<16x32xf32, #tpu.memory_space<vmem>>, %arg4: memref<32x32xf32, #tpu.memory_space<vmem>>, %arg5: memref<1x32xf32, #tpu.memory_space<vmem>>, %arg6: memref<16x32xf32, #tpu.memory_space<vmem>>, %arg7: memref<16x32xf32, #tpu.memory_space<vmem>>) attributes {dimension_semantics = [#tpu.dimension_semantics<parallel>, #tpu.dimension_semantics<parallel>, #tpu.dimension_semantics<arbitrary>], iteration_bounds = array<i64: 1, 1, 1>, scalar_prefetch = 0 : i64, scratch_operands = 1 : i64, tpu.core_type = #tpu.core_type<tc>, window_params = [{transform_indices = @transform_0, window_bounds = array<i64: 16, 32>}, {transform_indices = @transform_1, window_bounds = array<i64: 32, 32>}, {transform_indices = @transform_2, window_bounds = array<i64: 1, 32>}, {transform_indices = @transform_3, window_bounds = array<i64: 16, 32>}]} {
    %c0_i32 = arith.constant 0 : i32
    %0 = arith.cmpi eq, %arg2, %c0_i32 : i32
    %1 = arith.extui %0 : i1 to i32
    %c0_i32_0 = arith.constant 0 : i32
    %2 = arith.cmpi ne, %1, %c0_i32_0 : i32
    scf.if %2 {
      %cst_10 = arith.constant 0.000000e+00 : f32
      %12 = vector.broadcast %cst_10 : f32 to vector<16x32xf32>
      %c0_11 = arith.constant 0 : index
      %c0_12 = arith.constant 0 : index
      %13 = vector.load %arg7[%c0_11, %c0_12] : memref<16x32xf32, #tpu.memory_space<vmem>>, vector<16x32xf32>
      tpu.vector_store %arg7[%c0_11, %c0_12], %12 {strides = array<i32>} : memref<16x32xf32, #tpu.memory_space<vmem>>, vector<16x32xf32>,
    } else {
    }
    %c0 = arith.constant 0 : index
    %c0_1 = arith.constant 0 : index
    %3 = vector.load %arg7[%c0, %c0_1] : memref<16x32xf32, #tpu.memory_space<vmem>>, vector<16x32xf32>
    %c0_2 = arith.constant 0 : index
    %c0_3 = arith.constant 0 : index
    %4 = vector.load %arg3[%c0_2, %c0_3] : memref<16x32xf32, #tpu.memory_space<vmem>>, vector<16x32xf32>
    %c0_4 = arith.constant 0 : index
    %c0_5 = arith.constant 0 : index
    %5 = vector.load %arg4[%c0_4, %c0_5] : memref<32x32xf32, #tpu.memory_space<vmem>>, vector<32x32xf32>
    %cst = arith.constant dense<0.000000e+00> : vector<16x32xf32>
    %6 = tpu.matmul %4, %5, %cst {dimension_numbers = #tpu.dot_dimension_numbers<[1], [0], [0], [1], [0, 0, 1, 1], [], []>} : vector<16x32xf32>, vector<32x32xf32>, vector<16x32xf32> -> vector<16x32xf32>
    %7 = arith.addf %3, %6 : vector<16x32xf32>
    %c0_6 = arith.constant 0 : index
    %c0_7 = arith.constant 0 : index
    %8 = vector.load %arg7[%c0_6, %c0_7] : memref<16x32xf32, #tpu.memory_space<vmem>>, vector<16x32xf32>
    tpu.vector_store %arg7[%c0_6, %c0_7], %7 {strides = array<i32>} : memref<16x32xf32, #tpu.memory_space<vmem>>, vector<16x32xf32>,
    %c0_i32_8 = arith.constant 0 : i32
    %9 = arith.cmpi eq, %arg2, %c0_i32_8 : i32
    %10 = arith.extui %9 : i1 to i32
    %c0_i32_9 = arith.constant 0 : i32
    %11 = arith.cmpi ne, %10, %c0_i32_9 : i32
    scf.if %11 {
      %c0_10 = arith.constant 0 : index
      %c0_11 = arith.constant 0 : index
      %12 = vector.load %arg7[%c0_10, %c0_11] : memref<16x32xf32, #tpu.memory_space<vmem>>, vector<16x32xf32>
      %c0_12 = arith.constant 0 : index
      %c0_13 = arith.constant 0 : index
      %13 = vector.load %arg5[%c0_12, %c0_13] : memref<1x32xf32, #tpu.memory_space<vmem>>, vector<1x32xf32>
      %14 = vector.broadcast %13 : vector<1x32xf32> to vector<16x32xf32>
      %15 = arith.addf %12, %14 : vector<16x32xf32>
      %c0_14 = arith.constant 0 : index
      %c0_15 = arith.constant 0 : index
      %16 = vector.load %arg6[%c0_14, %c0_15] : memref<16x32xf32, #tpu.memory_space<vmem>>, vector<16x32xf32>
      tpu.vector_store %arg6[%c0_14, %c0_15], %15 {strides = array<i32>} : memref<16x32xf32, #tpu.memory_space<vmem>>, vector<16x32xf32>,
    } else {
    }
    return
  }
  func.func @transform_0(%arg0: i32, %arg1: i32, %arg2: i32) -> (i32, i32) {
    %c0_i32 = arith.constant 0 : i32
    return %arg0, %arg2 : i32, i32
  }
  func.func @transform_1(%arg0: i32, %arg1: i32, %arg2: i32) -> (i32, i32) {
    %c0_i32 = arith.constant 0 : i32
    return %arg2, %arg1 : i32, i32
  }
  func.func @transform_2(%arg0: i32, %arg1: i32, %arg2: i32) -> (i32, i32) {
    %c0_i32 = arith.constant 0 : i32
    %c0_i32_0 = arith.constant 0 : i32
    return %c0_i32, %arg1 : i32, i32
  }
  func.func @transform_3(%arg0: i32, %arg1: i32, %arg2: i32) -> (i32, i32) {
    %c0_i32 = arith.constant 0 : i32
    return %arg0, %arg1 : i32, i32
  }
}

</mosaic_0001>

<bundles_post_ra>
// kernel: tpu_custom_call.1
= control target key start
LH: loop header
LB: loop body
LE: loop exit
PB: predicated region body
PF: predicated region fallthrough
CT: control target
= control target key end

     0   :  { %8 = vsyncpa [#allocation4], 0  ;;  %s366_s0 = inlined_call_operand.hbm [shape: f32[16,32], index: 0, kind: input, shape index: {}]   ;;  %s367_s1 = inlined_call_operand.hbm [shape: f32[32,32], index: 1, kind: input, shape index: {}]   ;;  %s368_s2 = inlined_call_operand.vmem [shape: f32[1,32], index: 2, kind: input, shape index: {}]   ;;  %s369_s3 = inlined_call_operand.hbm [shape: f32[16,32], index: 3, kind: output, shape index: {}]  }
   0x1   :  { %9 = vsyncpa [#allocation7], 0 }
   0x2   :  { %10 = vsyncpa [#allocation5], 0  ;;  %s284_s12 = smov [#allocation3]   ;;  %s212_s16 = scalar_lea.hbm %s366_s0, 256 }
   0x3   :  { %s16_s13 = sshll.u32 %s284_s12, 4  ;;  %p213_p0 = scmp.ne.s32.totalorder %s366_s0, %s212_s16  ;;  %s17_s13 = int_to_ptr.vmem [resolvable:$true] %s16_s13 }
   0x4   :  { %p216_p1 = scmp.lt.u32.totalorder %s212_s16, %s366_s0 }
   0x6   :  { %p218_p2 = pnand %p216_p1, %p213_p0 }
   0x8   :  { %221 = shalt.err (!%p218_p2)
}
   0x9   :  { %s222_s21 = scalar_lea.vmem %s17_s13, 256  ;;  %p227_p4 = scmp.lt.s32.totalorder %s17_s13, %s17_s13 }
   0xa   :  { %p223_p3 = scmp.ne.s32.totalorder %s17_s13, %s222_s21  ;;  %p228_p5 = scmp.lt.s32.totalorder %s222_s21, %s222_s21 }
   0xc   :  { %p229_p6 = por %p228_p5, %p227_p4 }
   0xe   :  { %p230_p7 = pnand %p229_p6, %p223_p3 }
  0x10   :  { %233 = shalt.err (!%p230_p7)
}
  0x11   :  { %s285_s22 = smov 128   ;;  %s286_s23 = smov 8  }
  0x12   :  { %22 = dma.hbm_to_vmem [thread:$0]  %s366_s0, 256, %s17_s13, [#allocation4], %s285_s22, %s285_s22, %s286_s23  }
  0x13   :  { %s287_s26 = smov [#allocation6]   ;;  %s234_s30 = scalar_lea.hbm %s367_s1, 512 }
  0x14   :  { %s28_s27 = sshll.u32 %s287_s26, 4  ;;  %p235_p8 = scmp.ne.s32.totalorder %s367_s1, %s234_s30  ;;  %s29_s27 = int_to_ptr.vmem [resolvable:$true] %s28_s27 }
  0x15   :  { %p238_p9 = scmp.lt.u32.totalorder %s234_s30, %s367_s1 }
  0x17   :  { %p240_p10 = pnand %p238_p9, %p235_p8 }
  0x19   :  { %243 = shalt.err (!%p240_p10)
}
  0x1a   :  { %s244_s8 = scalar_lea.vmem %s29_s27, 512  ;;  %p249_p12 = scmp.lt.s32.totalorder %s29_s27, %s29_s27 }
  0x1b   :  { %p245_p11 = scmp.ne.s32.totalorder %s29_s27, %s244_s8  ;;  %p250_p13 = scmp.lt.s32.totalorder %s244_s8, %s244_s8 }
  0x1d   :  { %p251_p0 = por %p250_p13, %p249_p12 }
  0x1f   :  { %p252_p1 = pnand %p251_p0, %p245_p11 }
  0x21   :  { %255 = shalt.err (!%p252_p1)
}
  0x22   :  { %34 = dma.hbm_to_vmem [thread:$0]  %s367_s1, 512, %s29_s27, [#allocation7], %s285_s22, %s285_s22, %s286_s23  }
  0x23   :  { %278 = dma.done.wait [#allocation4], 256  }
  0x24   :  { %279 = vsyncadd [#allocation4], 4294967040 }
  0x25   :  { %280 = dma.done.wait [#allocation7], 512  }
  0x26   :  { %281 = vsyncadd [#allocation7], 4294966784  ;;  %vm47_vm0 = vcmask 261120   ;;  %v288_v0 = vmov 0.0   ;;  %v54_v1 = vld [vmem:[#allocation6] sm:$0xff]  ;;  %v55_v2 = vld [vmem:[#allocation6 + $0x8] sm:$0xff] }
  0x27   :  { %49 = vst.msk [vmem:[#allocation2 + $0x8] sm:$0xff] %vm47_vm0, %v288_v0  ;;  %48 = vst.msk [vmem:[#allocation2] sm:$0xff] %vm47_vm0, %v288_v0  ;;  %v56_v3 = vld [vmem:[#allocation6 + $0x10] sm:$0xff]  ;;  %v198_v4 = vpack.c.bf16 %v55_v2, %v54_v1  ;;  %v57_v5 = vld [vmem:[#allocation6 + $0x18] sm:$0xff]  ;;  %s289_s11 = smov [#allocation8]  }
  0x28   :  { %v52_v6 = vld [vmem:[#allocation3] sm:$0xff]  ;;  %v202_v7 = vpack.c.bf16 %v57_v5, %v56_v3  ;;  %v53_v8 = vld [vmem:[#allocation3 + $0x8] sm:$0xff]  ;;  %v180_v15 = vld [vmem:[%s368_s2] ss:$0 sm:$0xff]  ;;  %s165_s12 = sshll.u32 %s289_s11, 4  ;;  %s166_s12 = int_to_ptr.vmem [resolvable:$true] %s165_s12 }
  0x29   :  { %195 = vmatprep.mubr.msk.f32.mxu0 %vm47_vm0, %v52_v6  ;;  %199 = vmatprep.subr.bf16.mxu0 %v198_v4  ;;  %s256_s13 = scalar_lea.vmem %s166_s12, 256  ;;  %p261_p3 = scmp.lt.s32.totalorder %s166_s12, %s166_s12 }
  0x2a   :  { %201 = vmatpush3.bf16.msra.mxu0 %v198_v4  ;;  %p257_p2 = scmp.ne.s32.totalorder %s166_s12, %s256_s13  ;;  %p262_p4 = scmp.lt.s32.totalorder %s256_s13, %s256_s13 }
  0x2b   :  { %203 = vmatprep.subr.bf16.mxu0 %v202_v7 }
  0x2c   :  { %p263_p5 = por %p262_p4, %p261_p3 }
  0x2e   :  { %205 = vmatpush3.bf16.msra.mxu0 %v202_v7  ;;  %v51_v9 = vld [vmem:[#allocation2 + $0x8] sm:$0xff]  ;;  %v50_v10 = vld [vmem:[#allocation2] sm:$0xff]  ;;  %p264_p6 = pnand %p263_p5, %p257_p2 }
  0x31   :  { %196 = vmatmul.mubr.msk.f32.vlgmr.msra.gmra.mrb[0].mxu0 %vm47_vm0, %v53_v8 }
 0x104   :  { %v197_v11 = vpop.f32.mrb[0].mxu0 }
 0x105   :  { %v141_v12 = vadd.f32 %v197_v11, %v51_v9  ;;  %v131_v13 = vpop.f32.mrb[1].mxu0 }
 0x106   :  { %v140_v14 = vadd.f32 %v131_v13, %v50_v10 }
 0x107   :  { %143 = vst.msk [vmem:[#allocation2 + $0x8] sm:$0xff] %vm47_vm0, %v141_v12 }
 0x108   :  { %142 = vst.msk [vmem:[#allocation2] sm:$0xff] %vm47_vm0, %v140_v14 }
 0x10e   :  { %v148_v16 = vld [vmem:[#allocation2 + $0x8] sm:$0xff] }
 0x10f   :  { %v147_v17 = vld [vmem:[#allocation2] sm:$0xff]  ;;  %v157_v18 = vadd.f32 %v180_v15, %v148_v16 }
 0x110   :  { %v156_v19 = vadd.f32 %v180_v15, %v147_v17 }
 0x111   :  { %159 = vst.msk [vmem:[#allocation8 + $0x8] sm:$0xff] %vm47_vm0, %v157_v18 }
 0x112   :  { %158 = vst.msk [vmem:[#allocation8] sm:$0xff] %vm47_vm0, %v156_v19 }
 0x113   :  { %267 = shalt.err (!%p264_p6)
}
 0x114   :  { %s268_s15 = scalar_lea.hbm %s369_s3, 256 }
 0x115   :  { %p269_p7 = scmp.ne.s32.totalorder %s369_s3, %s268_s15  ;;  %p272_p8 = scmp.lt.u32.totalorder %s268_s15, %s369_s3 }
 0x117   :  { %p274_p9 = pnand %p272_p8, %p269_p7 }
 0x119   :  { %277 = shalt.err (!%p274_p9)
}
 0x11a   :  { %171 = dma.vmem_to_hbm [thread:$0]  %s166_s12, 256, %s369_s3, [#allocation5], %s285_s22, %s285_s22, %s286_s23  }
 0x11b   :  { %282 = dma.done.wait [#allocation5], 256  }
 0x11c   :  { %283 = vsyncadd [#allocation5], 4294967040 }
 0x11d   :  { %175 = vsyncpa [#allocation4], 1 }
 0x11e   :  { %176 = vsyncpa [#allocation7], 1 }
 0x11f   :  { %177 = vsyncpa [#allocation5], 1 }

</bundles_post_ra>
